<compile_context>
chip_gen: v5e
topology: v5e:2x2
jax: 0.10.0
libtpu: 0.0.40
codegen_flags: <defaults>
</compile_context>

<pallas_src>
import functools

import jax
import jax.numpy as jnp
from jax.experimental import pallas as pl
from jax.experimental.pallas import tpu as pltpu


def _round_up(x, m):
    return ((x + m - 1) // m) * m


def _sc_loss_kernel(x_ref, y_ref, out_ref, num_acc, den_acc, *,
                    total_rows, tile_rows, tiles_per_core, needs_mask):
    c = pl.program_id(0)   # row-range split ("parallel" -> both TCs on v7x)
    i = pl.program_id(1)   # sequential reduction over row tiles

    @pl.when(i == 0)
    def _():
        num_acc[...] = jnp.zeros_like(num_acc)
        den_acc[...] = jnp.zeros_like(den_acc)

    ex = jnp.exp(x_ref[...].astype(jnp.float32))
    ey = jnp.exp(y_ref[...].astype(jnp.float32))
    diff = ey - ex
    dd = diff * diff
    ee = ey * ey

    groups = tile_rows // 8
    freq = dd.shape[-1]

    def _accumulate(dd_v, ee_v):
        # VPU-only partial reduce: split rows into groups of 8 sublanes and sum
        # over the group axis (elementwise vreg adds, no cross-lane work).
        if groups == 1:
            num_acc[...] += dd_v
            den_acc[...] += ee_v
        else:
            num_acc[...] += jnp.sum(dd_v.reshape(groups, 8, freq), axis=0)
            den_acc[...] += jnp.sum(ee_v.reshape(groups, 8, freq), axis=0)

    if needs_mask:
        t = c * tiles_per_core + i             # global (unclamped) tile index
        is_ragged = (t + 1) * tile_rows > total_rows

        @pl.when(jnp.logical_not(is_ragged))
        def _():
            _accumulate(dd, ee)

        @pl.when(is_ragged)
        def _():
            rows = t * tile_rows + jax.lax.broadcasted_iota(
                jnp.int32, (tile_rows, 1), 0)
            valid = rows < total_rows          # (tile_rows, 1), broadcast in where
            _accumulate(jnp.where(valid, dd, 0.0), jnp.where(valid, ee, 0.0))
    else:
        _accumulate(dd, ee)

    @pl.when(i == pl.num_programs(1) - 1)
    def _():
        out_ref[0, 0, 0] = jnp.sum(num_acc[...])   # per-core partial numerator
        out_ref[0, 0, 1] = jnp.sum(den_acc[...])   # per-core partial denominator


def spectral_convergence_loss(x_mag, y_mag, *, max_tile_rows=2048, num_row_splits=2):
    """Pallas TPU implementation of SpectralConvergengeLoss.forward.

    Args:
      x_mag: (B, #frames, #freq_bins) predicted magnitude spectrogram.
      y_mag: (B, #frames, #freq_bins) ground-truth magnitude spectrogram.
    Returns:
      Scalar float32 loss.
    """
    assert x_mag.shape == y_mag.shape
    B, T, F = x_mag.shape
    R = B * T

    # Free reshape; inputs stay in HBM at native dtype, lane-dense freq axis.
    x2 = x_mag.reshape(R, F)
    y2 = y_mag.reshape(R, F)

    # Largest row tile whose 2 inputs x 2 pipeline buffers fit a ~24 MiB budget
    # (explicit vmem_limit_bytes below keeps this safe on v5e/v6e/v7x).
    itemsize = int(jnp.dtype(x2.dtype).itemsize)
    f_lanes = _round_up(F, 128)                 # VMEM lane padding of one tile row
    bytes_per_row = f_lanes * 2 * 2 * itemsize
    vmem_budget = 24 * 1024 * 1024
    cap_rows = max(8, (vmem_budget // bytes_per_row) // 8 * 8)
    tile_rows = int(min(max_tile_rows, cap_rows, _round_up(R, 8)))
    tile_rows = max(8, (tile_rows // 8) * 8)

    num_tiles = (R + tile_rows - 1) // tile_rows
    n_split = num_row_splits if num_tiles >= num_row_splits else 1
    tiles_per_core = (num_tiles + n_split - 1) // n_split
    total_tiles = n_split * tiles_per_core
    needs_mask = (total_tiles * tile_rows != R)

    def row_block_map(c, i):
        # Clamp so the (rare) round-up padding tiles on the last core stay
        # in-bounds for the DMA; their rows are zeroed by the in-kernel mask.
        return (jnp.minimum(c * tiles_per_core + i, num_tiles - 1), 0)

    kernel = functools.partial(
        _sc_loss_kernel,
        total_rows=R,
        tile_rows=tile_rows,
        tiles_per_core=tiles_per_core,
        needs_mask=needs_mask,
    )

    partials = pl.pallas_call(
        kernel,
        out_shape=jax.ShapeDtypeStruct((n_split, 1, 2), jnp.float32),
        grid_spec=pltpu.PrefetchScalarGridSpec(
            num_scalar_prefetch=0,
            grid=(n_split, tiles_per_core),
            in_specs=[
                pl.BlockSpec((tile_rows, F), row_block_map),
                pl.BlockSpec((tile_rows, F), row_block_map),
            ],
            out_specs=pl.BlockSpec(
                (1, 1, 2), lambda c, i: (c, 0, 0),
                memory_space=pltpu.MemorySpace.SMEM),
            scratch_shapes=[
                pltpu.VMEM((8, F), jnp.float32),   # numerator partial accumulator
                pltpu.VMEM((8, F), jnp.float32),   # denominator partial accumulator
            ],
        ),
        compiler_params=pltpu.CompilerParams(
            dimension_semantics=("parallel", "arbitrary"),
            vmem_limit_bytes=32 * 1024 * 1024,
        ),
        cost_estimate=pl.CostEstimate(
            flops=int(5 * R * F),
            transcendentals=int(2 * R * F),
            bytes_accessed=int(2 * R * F * itemsize + 8 * n_split),
        ),
    )(x2, y2)

    num = jnp.sum(partials[:, 0, 0])
    den = jnp.sum(partials[:, 0, 1])
    return jnp.sqrt(num) / jnp.sqrt(den)


def _reference(x_mag, y_mag):
    ey = jnp.exp(y_mag.astype(jnp.float32))
    ex = jnp.exp(x_mag.astype(jnp.float32))
    return jnp.linalg.norm((ey - ex).reshape(-1)) / jnp.linalg.norm(ey.reshape(-1))


if __name__ == "__main__":
    key = jax.random.PRNGKey(0)

    def check(B, T, F, max_tile_rows=2048, rtol=1e-4):
        kx, ky = jax.random.split(jax.random.fold_in(key, B * 100003 + T * 131 + F))
        # keep magnitudes modest so exp() stays well inside f32 range
        x_mag = jax.random.uniform(kx, (B, T, F), jnp.float32, 0.0, 2.0)
        y_mag = jax.random.uniform(ky, (B, T, F), jnp.float32, 0.0, 2.0)
        loss = jax.block_until_ready(
            spectral_convergence_loss(x_mag, y_mag, max_tile_rows=max_tile_rows))
        ref = _reference(x_mag, y_mag)
        assert jnp.allclose(loss, ref, rtol=rtol, atol=1e-6), (B, T, F, loss, ref)

    # Case 1: shapes that tile evenly (maskless fast path).
    check(2, 16, 128)
    # Case 2: ragged row count (in-kernel row-mask path).
    check(2, 21, 128)
    # Case 3: STFT-like non-x128 freq bins, multi-tile, 2-way core split,
    #         clamped round-up padding tile on the last core.
    check(3, 50, 257, max_tile_rows=64)

    print("KERNEL_OK")
</pallas_src>

<mosaic_0001>
module attributes {stable_mosaic.version = 11 : i64} {
  func.func @_sc_loss_kernel(%arg0: i32, %arg1: i32, %arg2: memref<32x128xf32, #tpu.memory_space<vmem>>, %arg3: memref<32x128xf32, #tpu.memory_space<vmem>>, %arg4: memref<1x1x2xf32, #tpu.memory_space<smem>>, %arg5: memref<8x128xf32, #tpu.memory_space<vmem>>, %arg6: memref<8x128xf32, #tpu.memory_space<vmem>>) attributes {dimension_semantics = [#tpu.dimension_semantics<parallel>, #tpu.dimension_semantics<arbitrary>], iteration_bounds = array<i64: 1, 1>, scalar_prefetch = 0 : i64, scratch_operands = 2 : i64, tpu.core_type = #tpu.core_type<tc>, window_params = [{transform_indices = @transform_0, window_bounds = array<i64: 32, 128>}, {transform_indices = @transform_1, window_bounds = array<i64: 32, 128>}, {transform_indices = @transform_2, window_bounds = array<i64: 1, 1, 2>}]} {
    %c0_i32 = arith.constant 0 : i32
    %0 = arith.cmpi eq, %arg1, %c0_i32 : i32
    %1 = arith.extui %0 : i1 to i32
    %c0_i32_0 = arith.constant 0 : i32
    %2 = arith.cmpi ne, %1, %c0_i32_0 : i32
    scf.if %2 {
      %cst_15 = arith.constant 0.000000e+00 : f32
      %23 = vector.broadcast %cst_15 : f32 to vector<8x128xf32>
      %c0_16 = arith.constant 0 : index
      %c0_17 = arith.constant 0 : index
      %24 = vector.load %arg5[%c0_16, %c0_17] : memref<8x128xf32, #tpu.memory_space<vmem>>, vector<8x128xf32>
      tpu.vector_store %arg5[%c0_16, %c0_17], %23 {strides = array<i32>} : memref<8x128xf32, #tpu.memory_space<vmem>>, vector<8x128xf32>,
      %cst_18 = arith.constant 0.000000e+00 : f32
      %25 = vector.broadcast %cst_18 : f32 to vector<8x128xf32>
      %c0_19 = arith.constant 0 : index
      %c0_20 = arith.constant 0 : index
      %26 = vector.load %arg6[%c0_19, %c0_20] : memref<8x128xf32, #tpu.memory_space<vmem>>, vector<8x128xf32>
      tpu.vector_store %arg6[%c0_19, %c0_20], %25 {strides = array<i32>} : memref<8x128xf32, #tpu.memory_space<vmem>>, vector<8x128xf32>,
    } else {
    }
    %c0 = arith.constant 0 : index
    %c0_1 = arith.constant 0 : index
    %3 = vector.load %arg2[%c0, %c0_1] : memref<32x128xf32, #tpu.memory_space<vmem>>, vector<32x128xf32>
    %4 = math.exp %3 : vector<32x128xf32>
    %c0_2 = arith.constant 0 : index
    %c0_3 = arith.constant 0 : index
    %5 = vector.load %arg3[%c0_2, %c0_3] : memref<32x128xf32, #tpu.memory_space<vmem>>, vector<32x128xf32>
    %6 = math.exp %5 : vector<32x128xf32>
    %7 = arith.subf %6, %4 : vector<32x128xf32>
    %8 = arith.mulf %7, %7 : vector<32x128xf32>
    %9 = arith.mulf %6, %6 : vector<32x128xf32>
    %c0_4 = arith.constant 0 : index
    %c0_5 = arith.constant 0 : index
    %10 = vector.load %arg5[%c0_4, %c0_5] : memref<8x128xf32, #tpu.memory_space<vmem>>, vector<8x128xf32>
    %11 = vector.shape_cast %8 : vector<32x128xf32> to vector<4x8x128xf32>
    %cst = arith.constant dense<0.000000e+00> : vector<8x128xf32>
    %12 = vector.multi_reduction <add>, %11, %cst [0] : vector<4x8x128xf32> to vector<8x128xf32>
    %13 = arith.addf %10, %12 : vector<8x128xf32>
    %c0_6 = arith.constant 0 : index
    %c0_7 = arith.constant 0 : index
    %14 = vector.load %arg5[%c0_6, %c0_7] : memref<8x128xf32, #tpu.memory_space<vmem>>, vector<8x128xf32>
    tpu.vector_store %arg5[%c0_6, %c0_7], %13 {strides = array<i32>} : memref<8x128xf32, #tpu.memory_space<vmem>>, vector<8x128xf32>,
    %c0_8 = arith.constant 0 : index
    %c0_9 = arith.constant 0 : index
    %15 = vector.load %arg6[%c0_8, %c0_9] : memref<8x128xf32, #tpu.memory_space<vmem>>, vector<8x128xf32>
    %16 = vector.shape_cast %9 : vector<32x128xf32> to vector<4x8x128xf32>
    %cst_10 = arith.constant dense<0.000000e+00> : vector<8x128xf32>
    %17 = vector.multi_reduction <add>, %16, %cst_10 [0] : vector<4x8x128xf32> to vector<8x128xf32>
    %18 = arith.addf %15, %17 : vector<8x128xf32>
    %c0_11 = arith.constant 0 : index
    %c0_12 = arith.constant 0 : index
    %19 = vector.load %arg6[%c0_11, %c0_12] : memref<8x128xf32, #tpu.memory_space<vmem>>, vector<8x128xf32>
    tpu.vector_store %arg6[%c0_11, %c0_12], %18 {strides = array<i32>} : memref<8x128xf32, #tpu.memory_space<vmem>>, vector<8x128xf32>,
    %c0_i32_13 = arith.constant 0 : i32
    %20 = arith.cmpi eq, %arg1, %c0_i32_13 : i32
    %21 = arith.extui %20 : i1 to i32
    %c0_i32_14 = arith.constant 0 : i32
    %22 = arith.cmpi ne, %21, %c0_i32_14 : i32
    scf.if %22 {
      %c0_15 = arith.constant 0 : index
      %c0_16 = arith.constant 0 : index
      %23 = vector.load %arg5[%c0_15, %c0_16] : memref<8x128xf32, #tpu.memory_space<vmem>>, vector<8x128xf32>
      %24 = vector.shape_cast %23 : vector<8x128xf32> to vector<1x8x128xf32>
      %cst_17 = arith.constant dense<0.000000e+00> : vector<1xf32>
      %25 = vector.multi_reduction <add>, %24, %cst_17 [1, 2] : vector<1x8x128xf32> to vector<1xf32>
      %26 = vector.shape_cast %25 : vector<1xf32> to vector<1x1x1xf32>
      %27 = vector.extract %26[0, 0, 0] : f32 from vector<1x1x1xf32>
      %c0_18 = arith.constant 0 : index
      %c0_19 = arith.constant 0 : index
      %c0_20 = arith.constant 0 : index
      %28 = memref.load %arg4[%c0_18, %c0_19, %c0_20] : memref<1x1x2xf32, #tpu.memory_space<smem>>
      memref.store %27, %arg4[%c0_18, %c0_19, %c0_20] : memref<1x1x2xf32, #tpu.memory_space<smem>>
      %c0_21 = arith.constant 0 : index
      %c0_22 = arith.constant 0 : index
      %29 = vector.load %arg6[%c0_21, %c0_22] : memref<8x128xf32, #tpu.memory_space<vmem>>, vector<8x128xf32>
      %30 = vector.shape_cast %29 : vector<8x128xf32> to vector<1x8x128xf32>
      %cst_23 = arith.constant dense<0.000000e+00> : vector<1xf32>
      %31 = vector.multi_reduction <add>, %30, %cst_23 [1, 2] : vector<1x8x128xf32> to vector<1xf32>
      %32 = vector.shape_cast %31 : vector<1xf32> to vector<1x1x1xf32>
      %33 = vector.extract %32[0, 0, 0] : f32 from vector<1x1x1xf32>
      %c0_24 = arith.constant 0 : index
      %c0_25 = arith.constant 0 : index
      %c1 = arith.constant 1 : index
      %34 = memref.load %arg4[%c0_24, %c0_25, %c1] : memref<1x1x2xf32, #tpu.memory_space<smem>>
      memref.store %33, %arg4[%c0_24, %c0_25, %c1] : memref<1x1x2xf32, #tpu.memory_space<smem>>
    } else {
    }
    return
  }
  func.func @transform_0(%arg0: i32, %arg1: i32) -> (i32, i32) {
    %c1_i32 = arith.constant 1 : i32
    %0 = arith.muli %arg0, %c1_i32 : i32
    %1 = arith.addi %0, %arg1 : i32
    %c0_i32 = arith.constant 0 : i32
    %2 = arith.minsi %1, %c0_i32 : i32
    %c0_i32_0 = arith.constant 0 : i32
    %c0_i32_1 = arith.constant 0 : i32
    return %2, %c0_i32_0 : i32, i32
  }
  func.func @transform_1(%arg0: i32, %arg1: i32) -> (i32, i32) {
    %c1_i32 = arith.constant 1 : i32
    %0 = arith.muli %arg0, %c1_i32 : i32
    %1 = arith.addi %0, %arg1 : i32
    %c0_i32 = arith.constant 0 : i32
    %2 = arith.minsi %1, %c0_i32 : i32
    %c0_i32_0 = arith.constant 0 : i32
    %c0_i32_1 = arith.constant 0 : i32
    return %2, %c0_i32_0 : i32, i32
  }
  func.func @transform_2(%arg0: i32, %arg1: i32) -> (i32, i32, i32) {
    %c0_i32 = arith.constant 0 : i32
    %c0_i32_0 = arith.constant 0 : i32
    %c0_i32_1 = arith.constant 0 : i32
    return %arg0, %c0_i32, %c0_i32_0 : i32, i32, i32
  }
}

</mosaic_0001>

<bundles_post_ra>
// kernel: tpu_custom_call.1
= control target key start
LH: loop header
LB: loop body
LE: loop exit
PB: predicated region body
PF: predicated region fallthrough
CT: control target
= control target key end

     0   :  { %7 = vsyncpa [#allocation5], 0  ;;  %s286_s0 = inlined_call_operand.hbm [shape: f32[32,128], index: 0, kind: input, shape index: {}]   ;;  %s287_s1 = inlined_call_operand.hbm [shape: f32[32,128], index: 1, kind: input, shape index: {}]   ;;  %s288_s2 = inlined_call_operand.hbm [shape: f32[1,1,2], index: 2, kind: output, shape index: {}]  }
   0x1   :  { %8 = vsyncpa [#allocation8], 0 }
   0x2   :  { %9 = vsyncpa [#allocation6], 0  ;;  %s20_s11 = sshll.u32 %s286_s0, 4  ;;  %s257_s12 = smov [#allocation4]   ;;  %s21_s11 = int_to_ptr.hbm [resolvable:$true] %s20_s11 }
   0x3   :  { %s22_s13 = sshll.u32 %s257_s12, 4  ;;  %s39_s16 = sshll.u32 %s287_s1, 4  ;;  %s23_s13 = int_to_ptr.vmem [resolvable:$true] %s22_s13  ;;  %s40_s16 = int_to_ptr.hbm [resolvable:$true] %s39_s16 }
   0x4   :  { %s258_s17 = smov 128   ;;  %s259_s18 = smov 8  }
   0x5   :  { %28 = dma.hbm_to_vmem [thread:$0]  %s21_s11, 512, %s23_s13, [#allocation5], %s258_s17, %s258_s17, %s259_s18  }
   0x6   :  { %s260_s19 = smov [#allocation7]  }
   0x7   :  { %s41_s20 = sshll.u32 %s260_s19, 4  ;;  %s42_s20 = int_to_ptr.vmem [resolvable:$true] %s41_s20 }
   0x8   :  { %47 = dma.hbm_to_vmem [thread:$0]  %s40_s16, 512, %s42_s20, [#allocation8], %s258_s17, %s258_s17, %s259_s18  }
   0x9   :  { %251 = dma.done.wait [#allocation5], 512  }
   0xa   :  { %252 = vsyncadd [#allocation5], 4294966784 }
   0xb   :  { %253 = dma.done.wait [#allocation8], 512  }
   0xc   :  { %254 = vsyncadd [#allocation8], 4294966784  ;;  %v70_v0 = vld [vmem:[#allocation4] sm:$0xff]  ;;  %v71_v1 = vld [vmem:[#allocation4 + $0x8] sm:$0xff]  ;;  %s150_s22 = sshll.u32 %s288_s2, 4  ;;  %s261_s24 = smov [#allocation9]   ;;  %s151_s22 = int_to_ptr.hbm [resolvable:$true] %s150_s22 }
   0xd   :  { %v72_v2 = vld [vmem:[#allocation4 + $0x10] sm:$0xff]  ;;  %v73_v3 = vld [vmem:[#allocation4 + $0x18] sm:$0xff]  ;;  %v74_v4 = vmul.f32 1.442695, %v70_v0  ;;  %v76_v5 = vmul.f32 1.442695, %v71_v1 }
   0xe   :  { %v82_v6 = vld [vmem:[#allocation7] sm:$0xff]  ;;  %v78_v7 = vmul.f32 1.442695, %v72_v2  ;;  %v80_v8 = vmul.f32 1.442695, %v73_v3  ;;  %v83_v9 = vld [vmem:[#allocation7 + $0x8] sm:$0xff] }
   0xf   :  { %v84_v10 = vld [vmem:[#allocation7 + $0x10] sm:$0xff]  ;;  %175 = vpow2.f32 %v74_v4  ;;  %v85_v11 = vld [vmem:[#allocation7 + $0x18] sm:$0xff]  ;;  %v86_v12 = vmul.f32 1.442695, %v82_v6  ;;  %v88_v13 = vmul.f32 1.442695, %v83_v9 }
  0x10   :  { %177 = vpow2.f32 %v76_v5  ;;  %v90_v14 = vmul.f32 1.442695, %v84_v10  ;;  %v92_v15 = vmul.f32 1.442695, %v85_v11 }
  0x11   :  { %179 = vpow2.f32 %v78_v7 }
  0x12   :  { %181 = vpow2.f32 %v80_v8 }
  0x13   :  { %183 = vpow2.f32 %v86_v12 }
  0x14   :  { %185 = vpow2.f32 %v88_v13 }
  0x15   :  { %v176_v16 = vpop.eup %175  ;;  %187 = vpow2.f32 %v90_v14 }
  0x16   :  { %v178_v17 = vpop.eup %177  ;;  %189 = vpow2.f32 %v92_v15 }
  0x17   :  { %v180_v18 = vpop.eup %179 }
  0x18   :  { %v182_v19 = vpop.eup %181 }
  0x19   :  { %v184_v20 = vpop.eup %183 }
  0x1a   :  { %v186_v21 = vpop.eup %185  ;;  %v94_v22 = vsub.f32 %v184_v20, %v176_v16  ;;  %v102_v30 = vmul.f32 %v184_v20, %v184_v20 }
  0x1b   :  { %v188_v23 = vpop.eup %187  ;;  %v95_v24 = vsub.f32 %v186_v21, %v178_v17  ;;  %v103_v31 = vmul.f32 %v186_v21, %v186_v21 }
  0x1c   :  { %v190_v25 = vpop.eup %189  ;;  %v96_v26 = vsub.f32 %v188_v23, %v180_v18  ;;  %v98_v27 = vmul.f32 %v94_v22, %v94_v22  ;;  %v104_v36 = vmul.f32 %v188_v23, %v188_v23 }
  0x1d   :  { %v97_v28 = vsub.f32 %v190_v25, %v182_v19  ;;  %v99_v29 = vmul.f32 %v95_v24, %v95_v24  ;;  %v113_v37 = vadd.f32 %v103_v31, %v102_v30  ;;  %v105_v39 = vmul.f32 %v190_v25, %v190_v25 }
  0x1e   :  { %v100_v32 = vmul.f32 %v96_v26, %v96_v26 }
  0x1f   :  { %v101_v33 = vmul.f32 %v97_v28, %v97_v28  ;;  %v107_v34 = vadd.f32 %v99_v29, %v98_v27  ;;  %v114_v40 = vadd.f32 %v113_v37, %v104_v36 }
  0x21   :  { %v108_v35 = vadd.f32 %v107_v34, %v100_v32  ;;  %v115_v41 = vadd.f32 %v114_v40, %v105_v39 }
  0x23   :  { %v109_v38 = vadd.f32 %v108_v35, %v101_v33 }
  0x25   :  { %122 = vadd.xlane.f32.xlu0 %v109_v38 }
  0x2d   :  { %134 = vadd.xlane.f32.xlu0 %v115_v41 }
  0x98   :  { %v123_v42 = vpop.xlane.xlu0 %122 }
  0x99   :  { %v124_v43 = vrot.slane %v123_v42, 4 }
  0x9b   :  { %v125_v44 = vadd.f32 %v124_v43, %v123_v42 }
  0x9d   :  { %v126_v45 = vrot.slane %v125_v44, 2 }
  0x9f   :  { %v127_v46 = vadd.f32 %v126_v45, %v125_v44 }
  0xa0   :  { %v135_v47 = vpop.xlane.xlu0 %134 }
  0xa1   :  { %v136_v48 = vrot.slane %v135_v47, 4  ;;  %v128_v49 = vrot.slane %v127_v46, 1 }
  0xa3   :  { %v137_v50 = vadd.f32 %v136_v48, %v135_v47  ;;  %v129_v51 = vadd.f32 %v128_v49, %v127_v46 }
  0xa5   :  { %v138_v52 = vrot.slane %v137_v50, 2  ;;  %166 = vpush %v129_v51 }
  0xa7   :  { %v139_v53 = vadd.f32 %v138_v52, %v137_v50 }
  0xa9   :  { %v140_v54 = vrot.slane %v139_v53, 1 }
  0xab   :  { %v141_v55 = vadd.f32 %v140_v54, %v139_v53 }
  0xad   :  { %168 = vpush %v141_v55 }
  0xd6   :  { %s167_s0 = spop %166 }
  0xd7   :  { %132 = sst [smem:[#allocation9]] %s167_s0 }
  0xde   :  { %s169_s23 = spop %168 }
  0xdf   :  { %144 = sst [smem:[#allocation9 + $0x1]] %s169_s23 }
  0xe0   :  { %153 = dma.smem_to_hbm %s261_s24, 16, %s151_s22, [#allocation6]  }
  0xe1   :  { %255 = dma.done.wait [#allocation6], 16  }
  0xe2   :  { %256 = vsyncadd [#allocation6], 4294967280 }
  0xe3   :  { %158 = sfence }
  0xe4   :  { %159 = vsyncpa [#allocation5], 1 }
  0xe5   :  { %160 = vsyncpa [#allocation8], 1 }
  0xe6   :  { %161 = vsyncpa [#allocation6], 1 }

</bundles_post_ra>
